<compile_context>
chip_gen: v7x
topology: tpu7x:2x2x1
jax: 0.10.0
libtpu: 0.0.40
codegen_flags: <defaults>
</compile_context>

<pallas_src>
import functools
from typing import Dict, Optional

import numpy as np
import jax
import jax.numpy as jnp
from jax.experimental import pallas as pl
from jax.experimental.pallas import tpu as pltpu

M_PAD = 8     # pad modality rows to one sublane group
LANES = 128   # lane-dense output width


# ----------------------------------------------------------------------------
# Pallas kernel: 3-layer MLP router + sigmoid + normalization over modalities
# ----------------------------------------------------------------------------
def _router_kernel(n_ref,            # SMEM (1,) int32 : number of valid rows
                   x_ref,            # VMEM (M_PAD, 2d) : combined inputs
                   w1_ref, b1_ref,   # VMEM (2d, d), (1, d)
                   w2_ref, b2_ref,   # VMEM (d, d/2), (1, d/2)
                   w3_ref,           # VMEM (1, d/2)  : last Linear as a row
                   b3_ref,           # SMEM (1,) f32  : last Linear bias
                   out_ref):         # VMEM (M_PAD, LANES)
    x = x_ref[...]                                            # (M_PAD, 2d)

    h1 = jnp.dot(x, w1_ref[...], preferred_element_type=jnp.float32)
    h1 = jnp.maximum(h1 + b1_ref[...], 0.0)                   # f32 (M_PAD, d)

    h2 = jnp.dot(h1.astype(w2_ref.dtype), w2_ref[...],
                 preferred_element_type=jnp.float32)
    h2 = jnp.maximum(h2 + b2_ref[...], 0.0)                   # f32 (M_PAD, d/2)

    # 1-output-column Linear as VPU multiply + row reduce (no MXU pop needed).
    logits = jnp.sum(h2 * w3_ref[...], axis=-1, keepdims=True) + b3_ref[0]

    w = jax.nn.sigmoid(logits)                                # (M_PAD, 1), f32

    # Normalize across the valid (non-padded) modalities.  Sigmoid > 0 so the
    # total is always > 0 (matches the PyTorch `if total > 0` fast path).
    rows = jax.lax.broadcasted_iota(jnp.int32, w.shape, 0)
    valid = rows < n_ref[0]
    w_valid = jnp.where(valid, w, 0.0)
    total = jnp.sum(w_valid)
    inv_total = pl.reciprocal(jnp.broadcast_to(total, w.shape), approx=True)
    w_norm = w_valid * inv_total                              # padded rows stay 0

    # Lane-dense store: broadcast the (M_PAD, 1) weights across 128 lanes.
    out_ref[...] = jnp.broadcast_to(w_norm, out_ref.shape)


# ----------------------------------------------------------------------------
# Cached, jitted entry point (built once per d_model)
# ----------------------------------------------------------------------------
@functools.lru_cache(maxsize=None)
def _get_router_fn(d_model: int, use_bf16_matmul: bool = True):
    del d_model  # shapes are taken from the inputs; key only prevents churn
    vmem = pl.BlockSpec(memory_space=pltpu.MemorySpace.VMEM)
    smem = pl.BlockSpec(memory_space=pltpu.MemorySpace.SMEM)

    call = pl.pallas_call(
        _router_kernel,
        out_shape=jax.ShapeDtypeStruct((M_PAD, LANES), jnp.float32),
        in_specs=[smem,            # n_valid
                  vmem,            # X
                  vmem, vmem,      # W1, b1
                  vmem, vmem,      # W2, b2
                  vmem,            # W3 row
                  smem],           # b3 scalar
        out_specs=vmem,
    )

    # TODO(synk): if the router is evaluated for many batch elements per step,
    # add a batched variant with grid=(B//tile,), weights kept resident via
    # constant index_maps, and dimension_semantics=("parallel",) for v7x 2-TC.
    @jax.jit
    def run(n_arr, X, w1, b1, w2, b2, w3_row, b3):
        if use_bf16_matmul:
            X = X.astype(jnp.bfloat16)
            w1 = w1.astype(jnp.bfloat16)
            w2 = w2.astype(jnp.bfloat16)
        return call(n_arr, X, w1, b1, w2, b2, w3_row, b3)

    return run


# ----------------------------------------------------------------------------
# Parameter init (deterministic, mimics nn.Linear default U(-1/sqrt(in), ..))
# ----------------------------------------------------------------------------
def init_router_params(d_model: int, key):
    dh = d_model // 2
    dims = [(2 * d_model, d_model), (d_model, dh), (dh, 1)]
    weights, biases = [], []
    for (fan_in, fan_out) in dims:
        key, kw, kb = jax.random.split(key, 3)
        bound = 1.0 / float(np.sqrt(fan_in))
        w = jax.random.uniform(kw, (fan_in, fan_out), jnp.float32, -bound, bound)
        b = jax.random.uniform(kb, (1, fan_out), jnp.float32, -bound, bound)
        weights.append(w)
        biases.append(b)
    w1, w2, w3 = weights
    b1, b2, b3 = biases
    w3_row = w3.reshape(1, dh)            # last Linear stored as a row (VPU path)
    b3_s = b3.reshape(1)                  # SMEM scalar
    return (w1, b1, w2, b2, w3_row, b3_s)


def _fit_to(v: jnp.ndarray, d: int) -> jnp.ndarray:
    """Defensive pad/truncate of a 1-D summary to exactly d elements.

    (Cases where the summary length != d would raise in the PyTorch module's
    Linear; here we pad/truncate instead of crashing.)"""
    v = v.reshape(-1)[:d]
    if v.shape[0] < d:
        v = jnp.pad(v, (0, d - v.shape[0]))
    return v


# ----------------------------------------------------------------------------
# Forward wrapper reproducing DynamicModalityRouter.forward semantics
# ----------------------------------------------------------------------------
def dynamic_modality_router(features: Dict[str, jnp.ndarray],
                            params,
                            d_model: int,
                            context: Optional[jnp.ndarray] = None,
                            as_dict: bool = True):
    names = list(features.keys())
    n_valid = len(names)
    assert 0 < n_valid <= M_PAD, "increase M_PAD for more modalities"

    rows = []
    for name in names:
        feat = features[name]
        if feat.ndim > 1:
            summary = feat.mean(axis=0) if feat.ndim == 2 else feat.reshape(-1)[:d_model]
        else:
            summary = feat
        summary = _fit_to(summary, d_model)
        if context is not None and context.shape[-1] == summary.shape[-1]:
            other = context
        else:
            other = summary
        rows.append(jnp.concatenate([summary, other], axis=-1).astype(jnp.float32))

    X = jnp.stack(rows, axis=0)                         # (M, 2d)
    X = jnp.pad(X, ((0, M_PAD - n_valid), (0, 0)))      # (M_PAD, 2d)
    n_arr = jnp.array([n_valid], dtype=jnp.int32)

    run = _get_router_fn(d_model)
    out = run(n_arr, X, *params)                        # (M_PAD, LANES) f32, on device

    w_dev = out[:n_valid, 0]                            # normalized routing weights
    if not as_dict:
        return w_dev                                    # stay on device

    # Single device->host transfer (no per-element .item()-style round trips).
    w_host = np.asarray(w_dev)
    return {name: float(w_host[i]) for i, name in enumerate(names)}


# ----------------------------------------------------------------------------
if __name__ == "__main__":
    d_model = 32
    key = jax.random.PRNGKey(0)
    key, k1, k2, k3, k4, kctx = jax.random.split(key, 6)

    params = init_router_params(d_model, key)

    # Small synthetic modality features (different dims exercise all branches).
    features = {
        "vision": jax.random.normal(k1, (16, d_model), jnp.float32),   # 2D -> mean(dim=0)
        "audio":  jax.random.normal(k2, (8, d_model), jnp.float32),    # 2D -> mean(dim=0)
        "text":   jax.random.normal(k3, (d_model,), jnp.float32),      # 1D -> as-is
        "depth":  jax.random.normal(k4, (2, 4, 16), jnp.float32),      # 3D -> flatten[:d_model]
    }
    context = jax.random.normal(kctx, (d_model,), jnp.float32)

    # Device-array path (no host sync inside the router).
    w_dev = dynamic_modality_router(features, params, d_model,
                                    context=context, as_dict=False)
    w_dev = jax.block_until_ready(w_dev)

    # Dict path (one host transfer), exercised twice to hit the compile cache.
    weights = dynamic_modality_router(features, params, d_model, context=context)
    weights = dynamic_modality_router(features, params, d_model, context=context)

    total = sum(weights.values())
    assert abs(total - 1.0) < 5e-3, f"weights not normalized: {total}"
    assert all(w > 0.0 for w in weights.values())
    assert np.allclose(np.asarray(w_dev), np.array([weights[n] for n in features]),
                       atol=1e-6)
    print("KERNEL_OK")
</pallas_src>

<mosaic_0001>
module attributes {stable_mosaic.version = 11 : i64} {
  func.func @_router_kernel(%arg0: memref<1xi32, #tpu.memory_space<smem>>, %arg1: memref<8x64xbf16, #tpu.memory_space<vmem>>, %arg2: memref<64x32xbf16, #tpu.memory_space<vmem>>, %arg3: memref<1x32xf32, #tpu.memory_space<vmem>>, %arg4: memref<32x16xbf16, #tpu.memory_space<vmem>>, %arg5: memref<1x16xf32, #tpu.memory_space<vmem>>, %arg6: memref<1x16xf32, #tpu.memory_space<vmem>>, %arg7: memref<1xf32, #tpu.memory_space<smem>>, %arg8: memref<8x128xf32, #tpu.memory_space<vmem>>) attributes {dimension_semantics = [], scalar_prefetch = 0 : i64, scratch_operands = 0 : i64, tpu.core_type = #tpu.core_type<tc>} {
    %c0 = arith.constant 0 : index
    %c0_0 = arith.constant 0 : index
    %0 = vector.load %arg1[%c0, %c0_0] : memref<8x64xbf16, #tpu.memory_space<vmem>>, vector<8x64xbf16>
    %c0_1 = arith.constant 0 : index
    %c0_2 = arith.constant 0 : index
    %1 = vector.load %arg2[%c0_1, %c0_2] : memref<64x32xbf16, #tpu.memory_space<vmem>>, vector<64x32xbf16>
    %cst = arith.constant dense<0.000000e+00> : vector<8x32xf32>
    %2 = tpu.matmul %0, %1, %cst {dimension_numbers = #tpu.dot_dimension_numbers<[1], [0], [0], [1], [0, 0, 1, 1], [], []>} : vector<8x64xbf16>, vector<64x32xbf16>, vector<8x32xf32> -> vector<8x32xf32>
    %c0_3 = arith.constant 0 : index
    %c0_4 = arith.constant 0 : index
    %3 = vector.load %arg3[%c0_3, %c0_4] : memref<1x32xf32, #tpu.memory_space<vmem>>, vector<1x32xf32>
    %4 = vector.broadcast %3 : vector<1x32xf32> to vector<8x32xf32>
    %5 = arith.addf %2, %4 : vector<8x32xf32>
    %cst_5 = arith.constant 0.000000e+00 : f32
    %6 = vector.broadcast %cst_5 : f32 to vector<8x32xf32>
    %7 = arith.maximumf %5, %6 : vector<8x32xf32>
    %8 = arith.truncf %7 : vector<8x32xf32> to vector<8x32xbf16>
    %c0_6 = arith.constant 0 : index
    %c0_7 = arith.constant 0 : index
    %9 = vector.load %arg4[%c0_6, %c0_7] : memref<32x16xbf16, #tpu.memory_space<vmem>>, vector<32x16xbf16>
    %cst_8 = arith.constant dense<0.000000e+00> : vector<8x16xf32>
    %10 = tpu.matmul %8, %9, %cst_8 {dimension_numbers = #tpu.dot_dimension_numbers<[1], [0], [0], [1], [0, 0, 1, 1], [], []>} : vector<8x32xbf16>, vector<32x16xbf16>, vector<8x16xf32> -> vector<8x16xf32>
    %c0_9 = arith.constant 0 : index
    %c0_10 = arith.constant 0 : index
    %11 = vector.load %arg5[%c0_9, %c0_10] : memref<1x16xf32, #tpu.memory_space<vmem>>, vector<1x16xf32>
    %12 = vector.broadcast %11 : vector<1x16xf32> to vector<8x16xf32>
    %13 = arith.addf %10, %12 : vector<8x16xf32>
    %cst_11 = arith.constant 0.000000e+00 : f32
    %14 = vector.broadcast %cst_11 : f32 to vector<8x16xf32>
    %15 = arith.maximumf %13, %14 : vector<8x16xf32>
    %c0_12 = arith.constant 0 : index
    %c0_13 = arith.constant 0 : index
    %16 = vector.load %arg6[%c0_12, %c0_13] : memref<1x16xf32, #tpu.memory_space<vmem>>, vector<1x16xf32>
    %17 = vector.broadcast %16 : vector<1x16xf32> to vector<8x16xf32>
    %18 = arith.mulf %15, %17 : vector<8x16xf32>
    %cst_14 = arith.constant dense<0.000000e+00> : vector<8xf32>
    %19 = vector.multi_reduction <add>, %18, %cst_14 [1] : vector<8x16xf32> to vector<8xf32>
    %20 = vector.shape_cast %19 : vector<8xf32> to vector<8x1xf32>
    %c0_15 = arith.constant 0 : index
    %21 = memref.load %arg7[%c0_15] : memref<1xf32, #tpu.memory_space<smem>>
    %22 = vector.broadcast %21 : f32 to vector<8x1xf32>
    %23 = arith.addf %20, %22 : vector<8x1xf32>
    %24 = arith.negf %23 : vector<8x1xf32>
    %25 = math.exp %24 : vector<8x1xf32>
    %cst_16 = arith.constant 1.000000e+00 : f32
    %26 = vector.broadcast %cst_16 : f32 to vector<8x1xf32>
    %27 = arith.addf %26, %25 : vector<8x1xf32>
    %28 = arith.divf %26, %27 : vector<8x1xf32>
    %29 = tpu.iota {dimensions = array<i32: 0>} : vector<8x1xi32>
    %c0_17 = arith.constant 0 : index
    %30 = memref.load %arg0[%c0_17] : memref<1xi32, #tpu.memory_space<smem>>
    %31 = vector.broadcast %30 : i32 to vector<8x1xi32>
    %32 = arith.cmpi slt, %29, %31 : vector<8x1xi32>
    %cst_18 = arith.constant 0.000000e+00 : f32
    %33 = vector.broadcast %cst_18 : f32 to vector<8x1xf32>
    %34 = arith.select %32, %28, %33 : vector<8x1xi1>, vector<8x1xf32>
    %35 = vector.shape_cast %34 : vector<8x1xf32> to vector<1x8x1xf32>
    %cst_19 = arith.constant dense<0.000000e+00> : vector<1xf32>
    %36 = vector.multi_reduction <add>, %35, %cst_19 [1, 2] : vector<1x8x1xf32> to vector<1xf32>
    %37 = vector.shape_cast %36 : vector<1xf32> to vector<1x1x1xf32>
    %38 = vector.extract %37[0, 0, 0] : f32 from vector<1x1x1xf32>
    %39 = vector.broadcast %38 : f32 to vector<8x1xf32>
    %40 = tpu.reciprocal %39 {approx = true} : vector<8x1xf32> -> vector<8x1xf32>
    %41 = arith.mulf %34, %40 : vector<8x1xf32>
    %42 = vector.shape_cast %41 : vector<8x1xf32> to vector<8x1xf32>
    %43 = vector.broadcast %42 : vector<8x1xf32> to vector<8x128xf32>
    %c0_20 = arith.constant 0 : index
    %c0_21 = arith.constant 0 : index
    %44 = vector.load %arg8[%c0_20, %c0_21] : memref<8x128xf32, #tpu.memory_space<vmem>>, vector<8x128xf32>
    tpu.vector_store %arg8[%c0_20, %c0_21], %43 {strides = array<i32>} : memref<8x128xf32, #tpu.memory_space<vmem>>, vector<8x128xf32>,
    return
  }
}

</mosaic_0001>

<bundles_post_ra>
// kernel: run.1
= control target key start
LH: loop header
LB: loop body
LE: loop exit
PB: predicated region body
PF: predicated region fallthrough
CT: control target
= control target key end

     0   :  { %v324_v1 = vmov 0.0   ;;  %vm325_vm0 = vmmov 0   ;;  %s420_s0 = inlined_call_operand.<no memory space> [shape: s32[1], index: 0, kind: input, shape index: {}]   ;;  %s421_s1 = inlined_call_operand.vmem [shape: bf16[8,64], index: 1, kind: input, shape index: {}]   ;;  %s422_s2 = inlined_call_operand.vmem [shape: bf16[64,32], index: 2, kind: input, shape index: {}]   ;;  %s423_s3 = inlined_call_operand.vmem [shape: f32[1,32], index: 3, kind: input, shape index: {}]   ;;  %s424_s4 = inlined_call_operand.vmem [shape: bf16[32,16], index: 4, kind: input, shape index: {}]   ;;  %s425_s5 = inlined_call_operand.vmem [shape: f32[1,16], index: 5, kind: input, shape index: {}]   ;;  %s426_s6 = inlined_call_operand.vmem [shape: f32[1,16], index: 6, kind: input, shape index: {}]   ;;  %s427_s7 = inlined_call_operand.<no memory space> [shape: f32[1], index: 7, kind: input, shape index: {}]   ;;  %s428_s8 = inlined_call_operand.hbm [shape: f32[8,128], index: 8, kind: output, shape index: {}]  }
   0x1   :  { %v288_v0 = vld [vmem:[%s422_s2] sm:$0xff]   ;;  %263 = vmatprep.subr.bf16.mxu0 %v324_v1  ;;  %275 = vmatprep.subr.bf16.mxu1 %v324_v1  ;;  %v289_v2 = vld [vmem:[%s422_s2 + $0x8] sm:$0xff]   ;;  %v290_v3 = vld [vmem:[%s422_s2 + $0x10] sm:$0xff]  }
   0x2   :  { %264 = vmatpush3.bf16.msra.mxu0 %v288_v0  ;;  %271 = vmatprep.mubr.msk.bf16.mxu0 %vm325_vm0, %v324_v1 }
   0x3   :  { %265 = vmatprep.subr.bf16.mxu0 %v324_v1  ;;  %279 = vmatprep.mubr.msk.bf16.mxu1 %vm325_vm0, %v324_v1 }
   0x6   :  { %266 = vmatpush3.bf16.msra.mxu0 %v289_v2 }
   0x7   :  { %15 = vsyncpa [#allocation5], 0  ;;  %267 = vmatprep.subr.bf16.mxu0 %v324_v1  ;;  %v291_v4 = vld [vmem:[%s422_s2 + $0x18] sm:$0xff]   ;;  %v33_v5 = vld [vmem:[%s421_s1] sm:$0xf]  ;;  %vm73_vm1 = vcmask 523264   ;;  %v200_v26 = vstv %s427_s7  ;;  %v208_v32 = vlaneseq  ;;  %v211_v34 = vstv %s420_s0 }
   0x8   :  { %v292_v6 = vld [vmem:[%s424_s4] sm:$0xff]   ;;  %v293_v7 = vld [vmem:[%s424_s4 + $0x8] sm:$0xff]   ;;  %vm142_vm2 = vcmask 261120   ;;  %vm195_vm3 = vcmask 130048   ;;  %vm214_vm5 = vcmask 7168   ;;  %s326_s23 = smov [#allocation4]  }
   0x9   :  { %276 = vmatpush3.bf16.msra.mxu1 %v292_v6  ;;  %v243_v8 = vld [vmem:[%s423_s3] ss:$0 sm:$0xff]  ;;  %v209_v33 = vshrl.u32 %v208_v32, 7  ;;  %s235_s24 = sshll.u32 %s326_s23, 4  ;;  %s236_s24 = int_to_ptr.vmem [resolvable:$true] %s235_s24 }
   0xa   :  { %268 = vmatpush3.bf16.msra.mxu0 %v290_v3  ;;  %277 = vmatprep.subr.bf16.mxu1 %v324_v1  ;;  %v249_v16 = vld [vmem:[%s425_s5] ss:$0 sm:$0xff]  ;;  %s300_s0 = scalar_lea.vmem %s236_s24, 128  ;;  %p305_p1 = scmp.lt.s32.totalorder %s236_s24, %s236_s24 }
   0xb   :  { %269 = vmatprep.subr.bf16.mxu0 %v324_v1  ;;  %v253_v21 = vld [vmem:[%s426_s6] ss:$0 sm:$0xff]  ;;  %vm212_vm4 = vcmp.lt.s32.totalorder %v209_v33, %v211_v34  ;;  %p301_p0 = scmp.ne.s32.totalorder %s236_s24, %s300_s0  ;;  %p306_p2 = scmp.lt.s32.totalorder %s300_s0, %s300_s0 }
   0xd   :  { %278 = vmatpush3.bf16.msra.mxu1 %v293_v7  ;;  %p307_p3 = por %p306_p2, %p305_p1 }
   0xe   :  { %270 = vmatpush3.bf16.msra.mxu0 %v291_v4 }
   0xf   :  { %p308_p4 = pnand %p307_p3, %p301_p0 }
  0x11   :  { %272 = vmatmul.mubr.msk.bf16.vlgmr.msra.gmra.mrb[0].mxu0 %vm73_vm1, %v33_v5 }
  0xe4   :  { %v111_v9 = vpop.f32.mrb[0].mxu0 }
  0xe5   :  { %v112_v10 = vadd.f32 %v243_v8, %v111_v9  ;;  %v273_v11 = vpop.f32.mrb[1].mxu0 }
  0xe6   :  { %v114_v12 = vpop.f32.mrb[2].mxu0 }
  0xe7   :  { %v117_v13 = vmax.f32 %v112_v10, 0.0  ;;  %v274_v14 = vpop.f32.mrb[3].mxu0 }
  0xe9   :  { %v118_v15 = vpack.c.bf16 %v117_v13, %v117_v13 }
  0xeb   :  { %280 = vmatmul.mubr.msk.bf16.vlgmr.msra.gmra.mrb[0].mxu1 %vm142_vm2, %v118_v15 }
 0x1be   :  { %v180_v17 = vpop.f32.mrb[0].mxu1 }
 0x1bf   :  { %v181_v18 = vadd.f32 %v249_v16, %v180_v17  ;;  %v281_v19 = vpop.f32.mrb[1].mxu1 }
 0x1c0   :  { %v183_v20 = vpop.f32.mrb[2].mxu1 }
 0x1c1   :  { %v186_v22 = vmax.f32 %v181_v18, 0.0  ;;  %v282_v23 = vpop.f32.mrb[3].mxu1 }
 0x1c3   :  { %v194_v24 = vmul.f32 %v253_v21, %v186_v22 }
 0x1c5   :  { %v196_v25 = vsel %vm195_vm3, %v194_v24, 0.0 }
 0x1c6   :  { %197 = vadd.xlane.f32.xlu0 %v196_v25 }
 0x253   :  { %v198_v27 = vpop.xlane.xlu0 %197 }
 0x254   :  { %v201_v28 = vadd.f32 %v200_v26, %v198_v27 }
 0x256   :  { %v254_v29 = vmul.f32 -1.442695, %v201_v28 }
 0x258   :  { %294 = vpow2.f32 %v254_v29 }
 0x262   :  { %v295_v30 = vpop.eup %294 }
 0x263   :  { %v205_v31 = vadd.f32 1.0, %v295_v30 }
 0x265   :  { %296 = vrcp.f32 %v205_v31 }
 0x26f   :  { %v297_v35 = vpop.eup %296 }
 0x270   :  { %v213_v36 = vsel %vm212_vm4, %v297_v35, 0.0 }
 0x271   :  { %v215_v37 = vsel %vm214_vm5, %v213_v36, 0.0 }
 0x272   :  { %216 = vadd.xlane.f32.xlu0 %v215_v37 }
 0x2ff   :  { %v217_v38 = vpop.xlane.xlu0 %216 }
 0x300   :  { %v218_v39 = vrot.slane %v217_v38, 4 }
 0x302   :  { %v219_v40 = vadd.f32 %v218_v39, %v217_v38 }
 0x304   :  { %v220_v41 = vrot.slane %v219_v40, 2 }
 0x306   :  { %v221_v42 = vadd.f32 %v220_v41, %v219_v40 }
 0x308   :  { %v222_v43 = vrot.slane %v221_v42, 1 }
 0x30a   :  { %v223_v44 = vadd.f32 %v222_v43, %v221_v42 }
 0x30c   :  { %283 = vpush %v223_v44 }
 0x33d   :  { %s284_s7 = spop %283 }
 0x33e   :  { %v225_v45 = vstv %s284_s7 }
 0x33f   :  { %298 = vrcp.f32 %v225_v45 }
 0x349   :  { %v299_v46 = vpop.eup %298 }
 0x34a   :  { %v227_v47 = vmul.f32 %v299_v46, %v213_v36 }
 0x34c   :  { %228 = vst [vmem:[#allocation4] sm:$0xff] %v227_v47 }
 0x34d   :  { %311 = shalt.err (!%p308_p4)
}
 0x34e   :  { %s312_s27 = scalar_lea.hbm %s428_s8, 128 }
 0x34f   :  { %p313_p5 = scmp.ne.s32.totalorder %s428_s8, %s312_s27  ;;  %p316_p6 = scmp.lt.u32.totalorder %s312_s27, %s428_s8 }
 0x351   :  { %p318_p7 = pnand %p316_p6, %p313_p5 }
 0x353   :  { %321 = shalt.err (!%p318_p7)
}
 0x354   :  { %238 = dma.vmem_to_hbm [thread:$0]  %s236_s24, 128, %s428_s8, [#allocation5]  }
 0x355   :  { %322 = dma.done.wait [#allocation5], 128  }
 0x356   :  { %323 = vsyncadd [#allocation5], 4294967168 }
 0x357   :  { %242 = vsyncpa [#allocation5], 1 }

</bundles_post_ra>
